<compile_context>
chip_gen: v6e
topology: v6e:2x2x1
jax: 0.10.0
libtpu: 0.0.40
codegen_flags: <defaults>
</compile_context>

<pallas_src>
import functools

import jax
import jax.numpy as jnp
from jax import lax
from jax.experimental import pallas as pl
from jax.experimental.pallas import tpu as pltpu

_LANE = 128
_MAX_TN = 4096  # hard cap on spatial lanes per grid step (diminishing returns above)


def _cdiv(a, b):
    return -(-a // b)


def _vmem_capacity_bytes():
    """Physical VMEM of the current TPU generation (fallback: v7x's 64 MiB)."""
    try:
        return int(pltpu.get_tpu_info().vmem_capacity_bytes)
    except Exception:
        return 64 * 1024 * 1024


def _plan(C, N, x_itemsize, att_itemsize, tn_cap=None):
    """Pick the spatial tile size, chunk count and vmem limit from HW capacity."""
    capacity = _vmem_capacity_bytes()
    budget = (capacity * 3) // 4            # ~48 MiB on v7x, ~96 MiB on v5e/v6e
    # Resident (C, C) buffers: attention (double-buffered) + f32 Gram scratch.
    cc_bytes = 2 * C * C * att_itemsize + C * C * 4
    # Per-step working set ~ 4 (C, tn) tiles (x in x2 buffers, out x2) plus one
    # f32 (C, tn) matmul result.  Keep it <= half the budget so the vmem limit
    # (~2x the working set) stays within the per-generation budget.
    per_col = 4 * C * x_itemsize + 4 * C
    avail = max(budget // 2 - cc_bytes, per_col * _LANE)
    tn_max = max(_LANE, min(_MAX_TN, (avail // per_col) // _LANE * _LANE))
    if tn_cap is not None:
        tn_max = max(_LANE, min(tn_max, (tn_cap // _LANE) * _LANE))
    # Balanced, lane-dense chunking of N.  No host-side padding: the ragged
    # tail (< tn dead lanes total) is handled in-kernel / by write clipping.
    lanes = _cdiv(N, _LANE)
    nk = _cdiv(lanes, tn_max // _LANE)
    tn = _cdiv(lanes, nk) * _LANE
    nk = _cdiv(N, tn)
    work = per_col * tn + cc_bytes
    vmem_limit = int(min(budget, max(2 * work, 16 * 1024 * 1024)))
    return tn, nk, vmem_limit


def _cam_energy_kernel(gamma_ref, x_ref, att_ref, acc_ref, *, n_total, tn, tc, nc):
    """Pass 1: accumulate E = X_rows X^T over N-chunks; finalize gamma*softmax."""
    i = pl.program_id(1)            # channel row-tile index
    k = pl.program_id(2)            # spatial chunk index (reduction axis)
    nk = pl.num_programs(2)

    @pl.when(k == 0)
    def _init():
        acc_ref[...] = jnp.zeros_like(acc_ref)

    x = x_ref[0]                                             # (C, tn), native dtype
    if nc > 1:
        start = pl.multiple_of(i * tc, tc)
        lhs = x_ref[0, pl.ds(start, tc), :]                  # (tc, tn) row tile
    else:
        lhs = x
    if n_total % tn != 0:
        # Statically-ragged spatial axis: zero the out-of-bounds tail columns
        # (their VMEM contents are undefined) before the Gram accumulation.
        col = k * tn + lax.broadcasted_iota(jnp.int32, (1, tn), 1)
        valid = col < n_total
        x = jnp.where(valid, x, jnp.zeros_like(x))
        if nc > 1:
            lhs = jnp.where(valid, lhs, jnp.zeros_like(lhs))
        else:
            lhs = x

    # E_rows += LHS @ X^T  (contract over the spatial axis), f32 accumulation.
    acc_ref[...] += lax.dot_general(
        lhs, x,
        dimension_numbers=(((1,), (1,)), ((), ())),
        preferred_element_type=jnp.float32,
    )

    @pl.when(k == nk - 1)
    def _finalize():
        energy = acc_ref[...]                                # (tc, C) f32
        # softmax(rowmax(E) - E) == exp(rowmin(E) - E) / sum  (shift-invariant);
        # gamma is folded in here so pass 2 is just dot + residual.
        e = jnp.exp(jnp.min(energy, axis=-1, keepdims=True) - energy)
        inv = pl.reciprocal(jnp.sum(e, axis=-1, keepdims=True), approx=False)
        att_ref[0] = (gamma_ref[0] * e * inv).astype(att_ref.dtype)


def _cam_apply_kernel(att_ref, x_ref, o_ref, *, bf16_matmul):
    """Pass 2: out_chunk = (gamma*attention) @ X_chunk + X_chunk."""
    x = x_ref[0]                                             # (C, tn)
    att = att_ref[0]                                         # (C, C), gamma folded in
    if bf16_matmul and att.dtype == jnp.float32:
        out = jnp.dot(att.astype(jnp.bfloat16), x.astype(jnp.bfloat16),
                      preferred_element_type=jnp.float32)
    else:
        out = jnp.dot(att, x, preferred_element_type=jnp.float32)
    o_ref[0] = (out + x.astype(jnp.float32)).astype(o_ref.dtype)


def cam_module_forward(x_nchw, gamma, *, tn_max=None, pass2_bf16_matmul=False):
    """CAM_Module forward.  x_nchw: (B, C, H, W); gamma: scalar (shape (1,))."""
    B, C, H, W = x_nchw.shape
    N = H * W
    x_dtype = x_nchw.dtype
    # Attention (with gamma folded) stays f32 for f32 inputs; for 16-bit inputs
    # it is rounded to the input dtype only after the gamma fold so the pass-2
    # matmul runs natively on the MXU.
    att_dtype = jnp.float32 if x_dtype == jnp.dtype(jnp.float32) else x_dtype

    tn, nk, vmem_limit = _plan(C, N, jnp.dtype(x_dtype).itemsize,
                               jnp.dtype(att_dtype).itemsize, tn_cap=tn_max)

    # Row-tile the Gram/softmax pass only when the batch axis alone cannot keep
    # both TensorCores busy (v7x megacore, B == 1).  Row tiling re-reads each x
    # chunk nc times, which is only worth paying when pass 1 is compute-bound.
    if B == 1 and C >= 512 and C % 256 == 0:
        tc = 256
    else:
        tc = C
    nc = C // tc

    x_bcn = x_nchw.reshape(B, C, N)
    gamma = jnp.asarray(gamma, dtype=jnp.float32).reshape(1)

    # Pass 1: per-batch channel attention (B, C, C); N is the trailing reduction axis.
    energy_kernel = functools.partial(_cam_energy_kernel,
                                      n_total=N, tn=tn, tc=tc, nc=nc)
    attention = pl.pallas_call(
        energy_kernel,
        out_shape=jax.ShapeDtypeStruct((B, C, C), att_dtype),
        grid=(B, nc, nk),
        in_specs=[
            pl.BlockSpec(memory_space=pltpu.MemorySpace.SMEM),    # gamma (1,)
            pl.BlockSpec((1, C, tn), lambda b, i, k: (b, 0, k)),  # x chunk (all rows)
        ],
        out_specs=pl.BlockSpec((1, tc, C), lambda b, i, k: (b, i, 0)),
        scratch_shapes=[pltpu.VMEM((tc, C), jnp.float32)],
        compiler_params=pltpu.CompilerParams(
            dimension_semantics=("parallel", "parallel", "arbitrary"),
            vmem_limit_bytes=vmem_limit,
        ),
    )(gamma, x_bcn)

    # Pass 2: out = (gamma*attention) @ X + X, fully parallel over (B, N-chunks).
    apply_kernel = functools.partial(_cam_apply_kernel,
                                     bf16_matmul=pass2_bf16_matmul)
    out_bcn = pl.pallas_call(
        apply_kernel,
        out_shape=jax.ShapeDtypeStruct((B, C, N), x_dtype),
        grid=(B, nk),
        in_specs=[
            pl.BlockSpec((1, C, C), lambda b, k: (b, 0, 0)),      # gamma*attention
            pl.BlockSpec((1, C, tn), lambda b, k: (b, 0, k)),     # x chunk
        ],
        out_specs=pl.BlockSpec((1, C, tn), lambda b, k: (b, 0, k)),
        compiler_params=pltpu.CompilerParams(
            dimension_semantics=("parallel", "parallel"),
            vmem_limit_bytes=vmem_limit,
        ),
    )(attention, x_bcn)

    return out_bcn.reshape(B, C, H, W)


def cam_module_reference(x_nchw, gamma):
    """Pure-JAX reference matching the PyTorch forward exactly (f32, exact matmuls)."""
    B, C, H, W = x_nchw.shape
    x = x_nchw.reshape(B, C, H * W).astype(jnp.float32)
    energy = jnp.einsum("bcn,bdn->bcd", x, x, precision=lax.Precision.HIGHEST)
    energy_new = jnp.max(energy, axis=-1, keepdims=True) - energy
    attention = jax.nn.softmax(energy_new, axis=-1)
    out = jnp.einsum("bcd,bdn->bcn", attention, x, precision=lax.Precision.HIGHEST)
    out = out.reshape(B, C, H, W)
    return (jnp.asarray(gamma, jnp.float32).reshape(()) * out
            + x_nchw.astype(jnp.float32)).astype(x_nchw.dtype)


if __name__ == "__main__":
    key = jax.random.PRNGKey(0)
    B, C, H, W = 2, 4, 16, 16
    x = jax.random.normal(key, (B, C, H, W), dtype=jnp.float32)

    # Parameter init per CAM_Module.__init__: gamma = zeros(1).
    gamma0 = jnp.zeros((1,), dtype=jnp.float32)
    out = cam_module_forward(x, gamma0)
    jax.block_until_ready(out)
    ref = cam_module_reference(x, gamma0)
    assert out.shape == (B, C, H, W)
    assert jnp.allclose(out, ref, atol=1e-4, rtol=1e-4)

    # Non-zero gamma exercises the attention path.
    gamma_nz = jnp.asarray([0.5], dtype=jnp.float32)
    out_nz = cam_module_forward(x, gamma_nz)
    jax.block_until_ready(out_nz)
    ref_nz = cam_module_reference(x, gamma_nz)
    assert jnp.allclose(out_nz, ref_nz, atol=1e-3, rtol=1e-3)

    # Forced small spatial tile -> exercises the chunked k-reduction path (nk=2).
    out_tiled = cam_module_forward(x, gamma_nz, tn_max=128)
    jax.block_until_ready(out_tiled)
    assert jnp.allclose(out_tiled, ref_nz, atol=1e-3, rtol=1e-3)

    # Non-128-multiple spatial size: exercises the in-kernel ragged-tail masking
    # (no host-side padding or output slicing).
    x_odd = jax.random.normal(jax.random.PRNGKey(1), (1, 4, 10, 10), jnp.float32)
    out_odd = cam_module_forward(x_odd, gamma_nz)
    jax.block_until_ready(out_odd)
    ref_odd = cam_module_reference(x_odd, gamma_nz)
    assert jnp.allclose(out_odd, ref_odd, atol=1e-3, rtol=1e-3)

    # B == 1 with many channels: exercises the row-tiled (dual-TensorCore) Gram pass.
    x_big = 0.1 * jax.random.normal(jax.random.PRNGKey(2), (1, 512, 16, 16),
                                    dtype=jnp.float32)
    out_big = cam_module_forward(x_big, gamma_nz)
    jax.block_until_ready(out_big)
    ref_big = cam_module_reference(x_big, gamma_nz)
    assert jnp.allclose(out_big, ref_big, atol=2e-3, rtol=2e-3)

    # Optional bf16 MXU path for f32 inputs (pass 2 only; gamma-scaled result is
    # added to the f32 residual, so it is far less precision-sensitive).
    out_fast = cam_module_forward(x, gamma_nz, pass2_bf16_matmul=True)
    jax.block_until_ready(out_fast)
    assert jnp.allclose(out_fast, ref_nz, atol=5e-2, rtol=5e-2)

    # bf16 input smoke test: native bf16 MXU matmuls with f32 accumulation.
    out_bf16 = cam_module_forward(x.astype(jnp.bfloat16), gamma_nz)
    jax.block_until_ready(out_bf16)
    assert out_bf16.shape == (B, C, H, W) and out_bf16.dtype == jnp.bfloat16
    assert bool(jnp.all(jnp.isfinite(out_bf16.astype(jnp.float32))))

    print("KERNEL_OK")
</pallas_src>

<mosaic_0001>
module attributes {stable_mosaic.version = 11 : i64} {
  func.func @_cam_energy_kernel(%arg0: i32, %arg1: i32, %arg2: i32, %arg3: memref<1xf32, #tpu.memory_space<smem>>, %arg4: memref<1x4x256xf32, #tpu.memory_space<vmem>>, %arg5: memref<1x4x4xf32, #tpu.memory_space<vmem>>, %arg6: memref<4x4xf32, #tpu.memory_space<vmem>>) attributes {dimension_semantics = [#tpu.dimension_semantics<parallel>, #tpu.dimension_semantics<parallel>, #tpu.dimension_semantics<arbitrary>], iteration_bounds = array<i64: 2, 1, 1>, scalar_prefetch = 0 : i64, scratch_operands = 1 : i64, tpu.core_type = #tpu.core_type<tc>, window_params = [{transform_indices = @transform_0, window_bounds = array<i64: 1>}, {transform_indices = @transform_1, window_bounds = array<i64: 1, 4, 256>}, {transform_indices = @transform_2, window_bounds = array<i64: 1, 4, 4>}]} {
    %c0_i32 = arith.constant 0 : i32
    %0 = arith.cmpi eq, %arg2, %c0_i32 : i32
    %1 = arith.extui %0 : i1 to i32
    %c0_i32_0 = arith.constant 0 : i32
    %2 = arith.cmpi ne, %1, %c0_i32_0 : i32
    scf.if %2 {
      %cst_9 = arith.constant 0.000000e+00 : f32
      %12 = vector.broadcast %cst_9 : f32 to vector<4x4xf32>
      %c0_10 = arith.constant 0 : index
      %c0_11 = arith.constant 0 : index
      %13 = vector.load %arg6[%c0_10, %c0_11] : memref<4x4xf32, #tpu.memory_space<vmem>>, vector<4x4xf32>
      tpu.vector_store %arg6[%c0_10, %c0_11], %12 {strides = array<i32>} : memref<4x4xf32, #tpu.memory_space<vmem>>, vector<4x4xf32>,
    } else {
    }
    %c0 = arith.constant 0 : index
    %c0_1 = arith.constant 0 : index
    %c0_2 = arith.constant 0 : index
    %3 = vector.load %arg4[%c0, %c0_1, %c0_2] : memref<1x4x256xf32, #tpu.memory_space<vmem>>, vector<1x4x256xf32>
    %4 = vector.shape_cast %3 : vector<1x4x256xf32> to vector<4x256xf32>
    %c0_3 = arith.constant 0 : index
    %c0_4 = arith.constant 0 : index
    %5 = vector.load %arg6[%c0_3, %c0_4] : memref<4x4xf32, #tpu.memory_space<vmem>>, vector<4x4xf32>
    %cst = arith.constant dense<0.000000e+00> : vector<4x4xf32>
    %6 = tpu.matmul %4, %4, %cst {dimension_numbers = #tpu.dot_dimension_numbers<[1], [1], [0], [0], [0, 0, 1, 0], [], []>} : vector<4x256xf32>, vector<4x256xf32>, vector<4x4xf32> -> vector<4x4xf32>
    %7 = arith.addf %5, %6 : vector<4x4xf32>
    %c0_5 = arith.constant 0 : index
    %c0_6 = arith.constant 0 : index
    %8 = vector.load %arg6[%c0_5, %c0_6] : memref<4x4xf32, #tpu.memory_space<vmem>>, vector<4x4xf32>
    tpu.vector_store %arg6[%c0_5, %c0_6], %7 {strides = array<i32>} : memref<4x4xf32, #tpu.memory_space<vmem>>, vector<4x4xf32>,
    %c0_i32_7 = arith.constant 0 : i32
    %9 = arith.cmpi eq, %arg2, %c0_i32_7 : i32
    %10 = arith.extui %9 : i1 to i32
    %c0_i32_8 = arith.constant 0 : i32
    %11 = arith.cmpi ne, %10, %c0_i32_8 : i32
    scf.if %11 {
      %c0_9 = arith.constant 0 : index
      %c0_10 = arith.constant 0 : index
      %12 = vector.load %arg6[%c0_9, %c0_10] : memref<4x4xf32, #tpu.memory_space<vmem>>, vector<4x4xf32>
      %cst_11 = arith.constant dense<0x7F800000> : vector<4xf32>
      %13 = vector.multi_reduction <minimumf>, %12, %cst_11 [1] : vector<4x4xf32> to vector<4xf32>
      %14 = vector.shape_cast %13 : vector<4xf32> to vector<4x1xf32>
      %15 = vector.broadcast %14 : vector<4x1xf32> to vector<4x4xf32>
      %16 = arith.subf %15, %12 : vector<4x4xf32>
      %17 = math.exp %16 : vector<4x4xf32>
      %cst_12 = arith.constant dense<0.000000e+00> : vector<4xf32>
      %18 = vector.multi_reduction <add>, %17, %cst_12 [1] : vector<4x4xf32> to vector<4xf32>
      %19 = vector.shape_cast %18 : vector<4xf32> to vector<4x1xf32>
      %20 = tpu.reciprocal %19 : vector<4x1xf32> -> vector<4x1xf32>
      %c0_13 = arith.constant 0 : index
      %21 = memref.load %arg3[%c0_13] : memref<1xf32, #tpu.memory_space<smem>>
      %22 = vector.broadcast %21 : f32 to vector<4x4xf32>
      %23 = arith.mulf %22, %17 : vector<4x4xf32>
      %24 = vector.broadcast %20 : vector<4x1xf32> to vector<4x4xf32>
      %25 = arith.mulf %23, %24 : vector<4x4xf32>
      %c0_14 = arith.constant 0 : index
      %c0_15 = arith.constant 0 : index
      %c0_16 = arith.constant 0 : index
      %26 = vector.load %arg5[%c0_14, %c0_15, %c0_16] : memref<1x4x4xf32, #tpu.memory_space<vmem>>, vector<1x4x4xf32>
      %27 = vector.shape_cast %26 : vector<1x4x4xf32> to vector<4x4xf32>
      %28 = vector.shape_cast %25 : vector<4x4xf32> to vector<1x4x4xf32>
      tpu.vector_store %arg5[%c0_14, %c0_15, %c0_16], %28 {strides = array<i32>} : memref<1x4x4xf32, #tpu.memory_space<vmem>>, vector<1x4x4xf32>,
    } else {
    }
    return
  }
  func.func @transform_0(%arg0: i32, %arg1: i32, %arg2: i32) -> i32 {
    %c0_i32 = arith.constant 0 : i32
    %c0_i32_0 = arith.constant 0 : i32
    return %c0_i32 : i32
  }
  func.func @transform_1(%arg0: i32, %arg1: i32, %arg2: i32) -> (i32, i32, i32) {
    %c0_i32 = arith.constant 0 : i32
    %c0_i32_0 = arith.constant 0 : i32
    return %arg0, %c0_i32, %arg2 : i32, i32, i32
  }
  func.func @transform_2(%arg0: i32, %arg1: i32, %arg2: i32) -> (i32, i32, i32) {
    %c0_i32 = arith.constant 0 : i32
    %c0_i32_0 = arith.constant 0 : i32
    return %arg0, %arg1, %c0_i32 : i32, i32, i32
  }
}

</mosaic_0001>

<bundles_post_ra>
// kernel: tpu_custom_call.1
= control target key start
LH: loop header
LB: loop body
LE: loop exit
PB: predicated region body
PF: predicated region fallthrough
CT: control target
= control target key end

     0   :  { %s744_s0 = inlined_call_operand.<no memory space> [shape: f32[1], index: 0, kind: input, shape index: {}]   ;;  %s745_s1 = inlined_call_operand.hbm [shape: f32[2,4,256], index: 1, kind: input, shape index: {}]   ;;  %s746_s2 = inlined_call_operand.hbm [shape: f32[2,4,4], index: 2, kind: output, shape index: {}]  }
   0x1   :  { %7 = sst [smem:[#allocation3]] %s744_s0 }
   0x2   :  { %8 = vsyncpa [#allocation5], 0 }
   0x3   :  { %10 = vsyncpa [#allocation5 + $0x1], 0 }
   0x4   :  { %11 = vsyncpa [#allocation6], 0 }
   0x5   :  { %13 = vsyncpa [#allocation6 + $0x1], 0  ;;  %s604_s11 = smov 0   ;;  %s606_s12 = smov 0  }
   0x6   :  { %s608_s13 = smov 0   ;;  %s610_s14 = smov 0  }
   0x7   :  { %s612_s15 = smov 0   ;;  %s614_s16 = smov 0  }
   0x8 LB: > { %s390_s0 = sadd.s32 4294967295, %s581_s16   ;;  %s391_s17 = sadd.s32 4294967294, %s581_s16   ;;  %s581_s16 = sphi %s614_s16, %s19_s16   ;;  %s577_s15 = sphi %s612_s15, %s758_s15   ;;  %s573_s14 = sphi %s610_s14, %s757_s14   ;;  %s569_s13 = sphi %s608_s13, %s756_s13   ;;  %s565_s12 = sphi %s606_s12, %s755_s12   ;;  %s561_s11 = sphi %s604_s11, %s754_s11  }
   0x9   : > { %s38_s18 = sadd.s32 1, %s577_s15  ;;  %s68_s19 = sadd.s32 1, %s569_s13 }
   0xa   : > { %p40_p0 = scmp.ge.s32.totalorder %s38_s18, 2  ;;  %p75_p1 = scmp.ne.s32.totalorder %s569_s13, %s565_s12 }
   0xb   : > { %p76_p2 = scmp.eq.s32.totalorder %s581_s16, 0  ;;  %p81_p3 = scmp.ne.s32.totalorder %s565_s12, %s561_s11 }
   0xc   : > { %s760_s18 = smov (%p40_p0, %s38_s18), 0  ;;  %p82_p5 = scmp.eq.s32.totalorder %s390_s0, 0 }
   0xd   : > { %p645_p4 = por %p76_p2, %p75_p1  ;;  %s63_s21 = ssub.s32 %s577_s15, %s760_s18 }
   0xe   : > { %p107_p6 = scmp.eq.s32.totalorder %s390_s0, 1  ;;  %p66_p7 = scmp.eq.s32.totalorder %s63_s21, 0 }
   0xf   : > { %p651_p8 = por %p82_p5, %p81_p3  ;;  %p113_p10 = scmp.eq.s32.totalorder %s391_s17, 1 }
  0x10   : > { %p655_p9 = por %p107_p6, %p75_p1  ;;  %p417_p13 = scmp.lt.s32.totalorder %s581_s16, 2 }
  0x11   : > { %s660_s24 = scalar_select %p66_p7, %s569_s13, %s68_s19  }
  0x12   : > { %p662_p11 = por %p113_p10, %p81_p3  ;;  %s136_s26 = sand.u32 1, %s569_s13  }
  0x13   : > { %s394_s27 = sshll.u32 %s136_s26, 3  ;;  %s404_s28 = sshll.u32 %s577_s15, 7 }
  0x14   : > { %s750_s25 = scalar_select %p662_p11, 1, 0 }
  0x15   : > { %s148_s3 = scalar_lea.hbm %s745_s1, %s404_s28  ;;  %s140_s4 = scalar_lea.vmem [#allocation4], %s394_s27 }
  0x16   : > { %s150_s5 = sshll.u32 %s140_s4, 4  ;;  %p675_p0 = pnand %p417_p13, %p645_p4  ;;  %s151_s5 = int_to_ptr.vmem [resolvable:$true] %s150_s5 }
  0x17   : > { %p397_p1 = scmp.ge.s32.totalorder %s581_s16, 1  ;;  %p155_p2 = scmp.lt.s32.totalorder %s581_s16, 3 }
  0x18   : > { %s137_s7 = scalar_lea.sflag [#allocation5], %s136_s26  ;;  %p475_p3 = pneg %p675_p0 }
  0x19   : > { %s486_s8 = scalar_lea.vmem %s151_s5, 128  ;;  %s583_s9 = smov [#allocation4]  }
  0x1a   : > { %p487_p5 = scmp.ne.s32.totalorder %s151_s5, %s486_s8  ;;  %s491_s10 = sshll.u32 %s583_s9, 4  ;;  %s492_s10 = int_to_ptr.vmem [resolvable:$false] %s491_s10 }
  0x1b   : > { %s493_s0 = scalar_lea.vmem %s492_s10, 256  ;;  %p494_p10 = scmp.lt.s32.totalorder %s151_s5, %s492_s10 }
  0x1c   : > { %p489_p6 = pnand %p487_p5, %p475_p3  ;;  %p495_p12 = scmp.lt.s32.totalorder %s493_s0, %s486_s8 }
  0x1e   : > { %p490_p7 = pneg %p489_p6  ;;  %p496_p4 = por %p495_p12, %p494_p10 }
  0x20   : > { %p497_p13 = pnand %p496_p4, %p490_p7 }
  0x22   : > { %500 = shalt.err (!%p497_p13)
}
  0x23   : > { %412 = dma.hbm_to_vmem [thread:$0]  (!%p675_p0), %s148_s3, 128, %s151_s5, %s137_s7  }
  0x24   : > { %p156_p11 = pnand %p397_p1, %p155_p2 }
  0x25   : > { %s690_s17 = sand.u32 (!%p156_p11), 1, %s565_s12  }
  0x26   : > { %159 = sbr.rel (%p156_p11) target bundleno = 579 (0x243), region = 28  ;;  %s398_s19 = sshll.u32 (!%p156_p11), %s690_s17, 3 }
  0x27   : > { %s162_s20 = scalar_lea.sflag (!%p156_p11), [#allocation5], %s690_s17  ;;  %s165_s21 = scalar_lea.vmem (!%p156_p11), [#allocation4], %s398_s19 }
  0x2b   : > { %552 = dma.done.wait (%p651_p8), %s162_s20, 128  }
  0x2c   : > { %554 = vsyncadd (%p651_p8), %s162_s20, 4294967168  ;;  %vm191_vm0 = vcmask 27648   ;;  %v584_v0 = vmov 0.0   ;;  %v193_v1 = vld [vmem:[%s165_s21] sm:$0xff]  ;;  %s285_s22 = sld [smem:[#allocation3]]  ;;  %s399_s26 = sshll.u32 %s690_s17, 2 }
  0x2d   : > { %192 = vst.msk [vmem:[#allocation2] sm:$0xf] %vm191_vm0, %v584_v0  ;;  %v196_v2 = vcombine.high %v193_v1, %v193_v1  ;;  %s401_s27 = sshll.u32 %s573_s14, 6  ;;  %s185_s28 = scalar_lea.vmem [#allocation7], %s399_s26 }
  0x2e   : > { %s305_s29 = sshll.u32 %s185_s28, 4  ;;  %s303_s4 = scalar_lea.hbm %s746_s2, %s401_s27  ;;  %s306_s29 = int_to_ptr.vmem [resolvable:$true] %s305_s29 }
  0x2f   : > { %228 = vmatprep.subr.mxu0 %v196_v2  ;;  %262 = vmatprep.mubr.f32.mxu0 %v196_v2  ;;  %s291_s5 = scalar_lea.sflag [#allocation6], %s690_s17  ;;  %s501_s6 = scalar_lea.vmem %s306_s29, 64 }
  0x30   : > { %229 = vmatpush1.xpose.msra.mxu0 %v193_v1  ;;  %p502_p8 = scmp.ne.s32.totalorder %s306_s29, %s501_s6  ;;  %s585_s7 = smov [#allocation7]  }
  0x31   : > { %s505_s14 = sshll.u32 %s585_s7, 4  ;;  %s506_s14 = int_to_ptr.vmem [resolvable:$false] %s505_s14 }
  0x32   : > { %v286_v15 = vstv %s285_s22  ;;  %p503_p11 = pnand %p502_p8, %p655_p9  ;;  %s507_s8 = scalar_lea.vmem %s506_s14, 128 }
  0x33   : > { %263 = vmatmul.mubr.f32.vlgmr.msra.gmra.mxu0 %v193_v1  ;;  %p508_p0 = scmp.lt.s32.totalorder %s306_s29, %s506_s14  ;;  %p509_p1 = scmp.lt.s32.totalorder %s507_s8, %s501_s6 }
  0x34   : > { %v194_v3 = vld [vmem:[#allocation2] sm:$0xf]  ;;  %p504_p12 = pneg %p503_p11 }
  0x35   : > { %p510_p2 = por %p509_p1, %p508_p0 }
  0x37   : > { %p511_p3 = pnand %p510_p2, %p504_p12 }
  0xf3   : > { %v264_v4 = vpop.f32.mrf.mxu0 }
  0xf4   : > { %v268_v5 = vadd.f32 %v264_v4, %v194_v3 }
  0xf5   : > { %v266_v6 = vpop.f32.mrf.mxu0 }
  0xf6   : > { %270 = vst.msk [vmem:[#allocation2] sm:$0xf] %vm191_vm0, %v268_v5 }
  0xfd   : > { %v274_v7 = vld [vmem:[#allocation2] sm:$0xf] }
  0xfe   : > { %v275_v8 = vsel %vm191_vm0, %v274_v7, inf }
  0xff   : > { %276 = vmin.xlane.f32.xlu0 %v275_v8 }
 0x188   : > { %v277_v9 = vpop.xlane.xlu0 %276 }
 0x189   : > { %v278_v10 = vsub.f32 %v277_v9, %v274_v7 }
 0x18b   : > { %v279_v11 = vmul.f32 1.442695, %v278_v10 }
 0x18d   : > { %469 = vpow2.f32 %v279_v11 }
 0x19a   : > { %v470_v12 = vpop.eup %469 }
 0x19b   : > { %v281_v13 = vsel %vm191_vm0, %v470_v12, 0.0  ;;  %v287_v16 = vmul.f32 %v470_v12, %v286_v15 }
 0x19c   : > { %282 = vadd.xlane.f32.xlu0 %v281_v13 }
 0x225   : > { %v283_v14 = vpop.xlane.xlu0 %282 }
 0x226   : > { %471 = vrcp.f32 %v283_v14 }
 0x233   : > { %v472_v17 = vpop.eup %471 }
 0x234   : > { %v288_v18 = vmul.f32 %v472_v17, %v287_v16 }
 0x236   : > { %289 = vst.msk [vmem:[%s185_s28] sm:$0xf] %vm191_vm0, %v288_v18 }
 0x237   : > { %514 = shalt.err (!%p511_p3)
}
 0x238   : > { %s515_s9 = scalar_lea.hbm %s303_s4, 64  ;;  %s519_s17 = scalar_lea.hbm %s746_s2, 128 }
 0x239   : > { %p516_p5 = scmp.ne.s32.totalorder %s303_s4, %s515_s9  ;;  %p520_p10 = scmp.lt.s32.totalorder %s303_s4, %s746_s2 }
 0x23a   : > { %p521_p4 = scmp.lt.s32.totalorder %s519_s17, %s515_s9 }
 0x23b   : > { %p517_p6 = pnand %p516_p5, %p655_p9 }
 0x23c   : > { %p522_p13 = por %p521_p4, %p520_p10 }
 0x23d   : > { %p518_p7 = pneg %p517_p6 }
 0x23f   : > { %p523_p8 = pnand %p522_p13, %p518_p7 }
 0x241   : > { %526 = shalt.err (!%p523_p8)
}
 0x242   : > { %407 = dma.vmem_to_hbm [thread:$0]  (%p655_p9), %s306_s29, 64, %s303_s4, %s291_s5  }
 0x243 PF: > { %s317_s21 = sand.u32 1, %s561_s11   ;;  %p752_p11 = scmp.ne.s32.totalorder %s750_s25, 0 }
 0x244   : > { %p753_p12 = scmp.ge.s32.totalorder %s581_s16, 2  ;;  %s318_s22 = scalar_lea.sflag [#allocation6], %s317_s21 }
 0x246   : > { %p414_p0 = pnand %p753_p12, %p752_p11 }
 0x248   : > { %p415_p1 = pneg %p414_p0 }
 0x24a   : > { %556 = dma.done.wait (%p415_p1), %s318_s22, 64  }
 0x24b   : > { %558 = vsyncadd (%p415_p1), %s318_s22, 4294967232  ;;  %s19_s16 = sadd.s32 1, %s581_s16   ;;  %s754_s11 = smov %s565_s12 }
 0x24c   : > { %p16_p2 = scmp.ge.s32.totalorder %s19_s16, 4   ;;  %s755_s12 = smov %s569_s13 }
 0x24d   : > { %s756_s13 = smov %s660_s24  ;;  %s757_s14 = smov %s577_s15 }
 0x24e   : > { %s758_s15 = smov %s760_s18  ;;  %18 = sbr.rel (!%p16_p2) target bundleno = 8 (0x8), region = 81 }
 0x253   :  { %323 = vsyncpa [#allocation5], 1 }
 0x254   :  { %325 = vsyncpa [#allocation5 + $0x1], 1 }
 0x255   :  { %326 = vsyncpa [#allocation6], 1 }
 0x256   :  { %328 = vsyncpa [#allocation6 + $0x1], 1 }

</bundles_post_ra>
